<compile_context>
chip_gen: v6e
topology: v6e:2x2x1
jax: 0.10.0
libtpu: 0.0.40
codegen_flags: <defaults>
</compile_context>

<pallas_src>
import jax
import jax.numpy as jnp
from jax.experimental import pallas as pl
from jax.experimental.pallas import tpu as pltpu


def _round_up(n, m):
    return ((n + m - 1) // m) * m


def _mlp_kernel(x_ref,
                w1_ref, c1_ref,
                w2_ref, c2_ref,
                w3_ref, b3_ref,
                o_ref):
    # Activations are [TB, F]: batch rows on sublanes, features on lanes.
    x = x_ref[...]                                                  # [TB, IN] f32

    # fc1 (+ folded bn1) + relu.  bf16 inputs to the MXU, f32 accumulate.
    h = jnp.dot(x.astype(jnp.bfloat16), w1_ref[...],
                preferred_element_type=jnp.float32)
    h = jnp.maximum(h + c1_ref[...], 0.0)                           # f32 VPU

    # dropout == identity at inference.

    # fc2 (+ folded bn2) + relu.
    h = jnp.dot(h.astype(jnp.bfloat16), w2_ref[...],
                preferred_element_type=jnp.float32)
    h = jnp.maximum(h + c2_ref[...], 0.0)

    # fc3, zero-padded to 128 output lanes -> unmasked lane-dense store.
    out = jnp.dot(h.astype(jnp.bfloat16), w3_ref[...],
                  preferred_element_type=jnp.float32)
    o_ref[...] = (out + b3_ref[...]).astype(o_ref.dtype)


def radar_point_classifier(x, params, *, block_b=1024):
    """x: [B, input_size] float32 -> logits [B, num_classes] float32."""
    B, in_features = x.shape
    num_classes = int(params["num_classes"])
    H = params["w1"].shape[1]
    out_pad = params["w3p"].shape[1]

    # Batch tile: multiple of 8 sublanes; pad B up to a whole number of tiles.
    tb = _round_up(min(block_b, _round_up(B, 8)), 8)
    Bp = _round_up(B, tb)
    if Bp != B:
        x = jnp.pad(x, ((0, Bp - B), (0, 0)))

    row = lambda i: (i, 0)     # batch-tiled operands
    fixed = lambda i: (0, 0)   # VMEM-resident weights/biases (same block every step)

    out = pl.pallas_call(
        _mlp_kernel,
        out_shape=jax.ShapeDtypeStruct((Bp, out_pad), jnp.float32),
        grid=(Bp // tb,),
        in_specs=[
            pl.BlockSpec((tb, in_features), row),
            pl.BlockSpec((in_features, H), fixed),
            pl.BlockSpec((1, H), fixed),
            pl.BlockSpec((H, H), fixed),
            pl.BlockSpec((1, H), fixed),
            pl.BlockSpec((H, out_pad), fixed),
            pl.BlockSpec((1, out_pad), fixed),
        ],
        out_specs=pl.BlockSpec((tb, out_pad), row),
        compiler_params=pltpu.CompilerParams(
            dimension_semantics=("parallel",),
            vmem_limit_bytes=64 * 1024 * 1024,
        ),
    )(x, params["w1"], params["c1"], params["w2"], params["c2"],
      params["w3p"], params["b3p"])

    return out[:B, :num_classes]


def init_raw_params(key, input_size=8, hidden_size=64, num_classes=2, eps=1e-5):
    """Raw Linear + BatchNorm1d parameters (PyTorch-style init, eval-mode stats)."""
    ks = jax.random.split(key, 10)
    f32 = jnp.float32

    def linear(kw, kb, fan_in, fan_out):
        bound = 1.0 / jnp.sqrt(f32(fan_in))
        w = jax.random.uniform(kw, (fan_in, fan_out), f32, -bound, bound)
        b = jax.random.uniform(kb, (1, fan_out), f32, -bound, bound)
        return w, b

    w1, b1 = linear(ks[0], ks[1], input_size, hidden_size)
    w2, b2 = linear(ks[2], ks[3], hidden_size, hidden_size)
    w3, b3 = linear(ks[4], ks[5], hidden_size, num_classes)

    def bn(kmu, kvar, n):
        gamma = jnp.ones((1, n), f32)
        beta = jnp.zeros((1, n), f32)
        mean = 0.1 * jax.random.normal(kmu, (1, n), f32)
        var = 1.0 + 0.1 * jax.random.uniform(kvar, (1, n), f32)
        return gamma, beta, mean, var

    g1, be1, m1, v1 = bn(ks[6], ks[7], hidden_size)
    g2, be2, m2, v2 = bn(ks[8], ks[9], hidden_size)

    return {
        "w1": w1, "b1": b1, "w2": w2, "b2": b2, "w3": w3, "b3": b3,
        "bn1": (g1, be1, m1, v1), "bn2": (g2, be2, m2, v2),
        "eps": eps, "num_classes": num_classes,
    }


def fold_params(raw, out_pad=128):
    """Fold BN into the linear layers, cast weights to bf16, pad fc3 to 128 lanes."""
    eps = raw["eps"]

    def fold(w, b, bn):
        gamma, beta, mean, var = bn
        scale = gamma / jnp.sqrt(var + eps)          # [1, H]
        shift = beta - mean * scale
        w_f = w * scale                              # column-wise fold
        c = b * scale + shift
        return w_f.astype(jnp.bfloat16), c.astype(jnp.float32)

    w1, c1 = fold(raw["w1"], raw["b1"], raw["bn1"])
    w2, c2 = fold(raw["w2"], raw["b2"], raw["bn2"])

    H, nc = raw["w3"].shape
    w3p = jnp.zeros((H, out_pad), jnp.float32).at[:, :nc].set(raw["w3"])
    b3p = jnp.zeros((1, out_pad), jnp.float32).at[:, :nc].set(raw["b3"])

    return {
        "w1": w1, "c1": c1,
        "w2": w2, "c2": c2,
        "w3p": w3p.astype(jnp.bfloat16), "b3p": b3p,
        "num_classes": nc,
    }


def _reference_kernel_precision(x, p):
    """Mirrors the kernel math (folded BN, bf16 dot inputs, f32 accumulate)."""
    h = jnp.dot(x.astype(jnp.bfloat16), p["w1"],
                preferred_element_type=jnp.float32) + p["c1"]
    h = jnp.maximum(h, 0.0)
    h = jnp.dot(h.astype(jnp.bfloat16), p["w2"],
                preferred_element_type=jnp.float32) + p["c2"]
    h = jnp.maximum(h, 0.0)
    out = jnp.dot(h.astype(jnp.bfloat16), p["w3p"],
                  preferred_element_type=jnp.float32) + p["b3p"]
    return out[:, :int(p["num_classes"])]


def _reference_f32(x, raw):
    """Original (unfolded, full-f32) eval-mode module math, for a loose sanity check."""
    eps = raw["eps"]

    def bn_apply(h, bn):
        gamma, beta, mean, var = bn
        return (h - mean) * gamma / jnp.sqrt(var + eps) + beta

    h = jnp.maximum(bn_apply(x @ raw["w1"] + raw["b1"], raw["bn1"]), 0.0)
    h = jnp.maximum(bn_apply(h @ raw["w2"] + raw["b2"], raw["bn2"]), 0.0)
    return h @ raw["w3"] + raw["b3"]


if __name__ == "__main__":
    key = jax.random.PRNGKey(0)
    k_param, k_x = jax.random.split(key)

    B, INPUT, HIDDEN, NUM_CLASSES = 200, 8, 64, 2   # ragged vs block_b=64 tail test
    raw = init_raw_params(k_param, input_size=INPUT, hidden_size=HIDDEN,
                          num_classes=NUM_CLASSES)
    params = fold_params(raw)
    x = jax.random.normal(k_x, (B, INPUT), jnp.float32)

    logits = radar_point_classifier(x, params, block_b=64)
    logits = jax.block_until_ready(logits)

    assert logits.shape == (B, NUM_CLASSES)

    # Exact-precision reference (same bf16/f32 mix as the kernel).
    ref = _reference_kernel_precision(x, params)
    assert jnp.allclose(logits, ref, atol=1e-3, rtol=1e-3), "mismatch vs kernel-precision reference"

    # Loose sanity check vs the original full-f32 module math (bf16 weight error only).
    ref32 = _reference_f32(x, raw)
    assert jnp.allclose(logits, ref32, atol=1e-1, rtol=1e-1), "mismatch vs f32 module reference"

    print("KERNEL_OK")
</pallas_src>

<mosaic_0001>
module attributes {stable_mosaic.version = 11 : i64} {
  func.func @_mlp_kernel(%arg0: i32, %arg1: memref<64x8xf32, #tpu.memory_space<vmem>>, %arg2: memref<8x64xbf16, #tpu.memory_space<vmem>>, %arg3: memref<1x64xf32, #tpu.memory_space<vmem>>, %arg4: memref<64x64xbf16, #tpu.memory_space<vmem>>, %arg5: memref<1x64xf32, #tpu.memory_space<vmem>>, %arg6: memref<64x128xbf16, #tpu.memory_space<vmem>>, %arg7: memref<1x128xf32, #tpu.memory_space<vmem>>, %arg8: memref<64x128xf32, #tpu.memory_space<vmem>>) attributes {dimension_semantics = [#tpu.dimension_semantics<parallel>], iteration_bounds = array<i64: 4>, scalar_prefetch = 0 : i64, scratch_operands = 0 : i64, tpu.core_type = #tpu.core_type<tc>, window_params = [{transform_indices = @transform_0, window_bounds = array<i64: 64, 8>}, {pipeline_mode = #tpu.pipeline_mode<synchronous>, transform_indices = @transform_1, window_bounds = array<i64: 8, 64>}, {pipeline_mode = #tpu.pipeline_mode<synchronous>, transform_indices = @transform_2, window_bounds = array<i64: 1, 64>}, {pipeline_mode = #tpu.pipeline_mode<synchronous>, transform_indices = @transform_3, window_bounds = array<i64: 64, 64>}, {pipeline_mode = #tpu.pipeline_mode<synchronous>, transform_indices = @transform_4, window_bounds = array<i64: 1, 64>}, {pipeline_mode = #tpu.pipeline_mode<synchronous>, transform_indices = @transform_5, window_bounds = array<i64: 64, 128>}, {pipeline_mode = #tpu.pipeline_mode<synchronous>, transform_indices = @transform_6, window_bounds = array<i64: 1, 128>}, {transform_indices = @transform_7, window_bounds = array<i64: 64, 128>}]} {
    %c0 = arith.constant 0 : index
    %c0_0 = arith.constant 0 : index
    %0 = vector.load %arg1[%c0, %c0_0] : memref<64x8xf32, #tpu.memory_space<vmem>>, vector<64x8xf32>
    %1 = arith.truncf %0 : vector<64x8xf32> to vector<64x8xbf16>
    %c0_1 = arith.constant 0 : index
    %c0_2 = arith.constant 0 : index
    %2 = vector.load %arg2[%c0_1, %c0_2] : memref<8x64xbf16, #tpu.memory_space<vmem>>, vector<8x64xbf16>
    %cst = arith.constant dense<0.000000e+00> : vector<64x64xf32>
    %3 = tpu.matmul %1, %2, %cst {dimension_numbers = #tpu.dot_dimension_numbers<[1], [0], [0], [1], [0, 0, 1, 1], [], []>} : vector<64x8xbf16>, vector<8x64xbf16>, vector<64x64xf32> -> vector<64x64xf32>
    %c0_3 = arith.constant 0 : index
    %c0_4 = arith.constant 0 : index
    %4 = vector.load %arg3[%c0_3, %c0_4] : memref<1x64xf32, #tpu.memory_space<vmem>>, vector<1x64xf32>
    %5 = vector.broadcast %4 : vector<1x64xf32> to vector<64x64xf32>
    %6 = arith.addf %3, %5 : vector<64x64xf32>
    %cst_5 = arith.constant 0.000000e+00 : f32
    %7 = vector.broadcast %cst_5 : f32 to vector<64x64xf32>
    %8 = arith.maximumf %6, %7 : vector<64x64xf32>
    %9 = arith.truncf %8 : vector<64x64xf32> to vector<64x64xbf16>
    %c0_6 = arith.constant 0 : index
    %c0_7 = arith.constant 0 : index
    %10 = vector.load %arg4[%c0_6, %c0_7] : memref<64x64xbf16, #tpu.memory_space<vmem>>, vector<64x64xbf16>
    %cst_8 = arith.constant dense<0.000000e+00> : vector<64x64xf32>
    %11 = tpu.matmul %9, %10, %cst_8 {dimension_numbers = #tpu.dot_dimension_numbers<[1], [0], [0], [1], [0, 0, 1, 1], [], []>} : vector<64x64xbf16>, vector<64x64xbf16>, vector<64x64xf32> -> vector<64x64xf32>
    %c0_9 = arith.constant 0 : index
    %c0_10 = arith.constant 0 : index
    %12 = vector.load %arg5[%c0_9, %c0_10] : memref<1x64xf32, #tpu.memory_space<vmem>>, vector<1x64xf32>
    %13 = vector.broadcast %12 : vector<1x64xf32> to vector<64x64xf32>
    %14 = arith.addf %11, %13 : vector<64x64xf32>
    %cst_11 = arith.constant 0.000000e+00 : f32
    %15 = vector.broadcast %cst_11 : f32 to vector<64x64xf32>
    %16 = arith.maximumf %14, %15 : vector<64x64xf32>
    %17 = arith.truncf %16 : vector<64x64xf32> to vector<64x64xbf16>
    %c0_12 = arith.constant 0 : index
    %c0_13 = arith.constant 0 : index
    %18 = vector.load %arg6[%c0_12, %c0_13] : memref<64x128xbf16, #tpu.memory_space<vmem>>, vector<64x128xbf16>
    %cst_14 = arith.constant dense<0.000000e+00> : vector<64x128xf32>
    %19 = tpu.matmul %17, %18, %cst_14 {dimension_numbers = #tpu.dot_dimension_numbers<[1], [0], [0], [1], [0, 0, 1, 1], [], []>} : vector<64x64xbf16>, vector<64x128xbf16>, vector<64x128xf32> -> vector<64x128xf32>
    %c0_15 = arith.constant 0 : index
    %c0_16 = arith.constant 0 : index
    %20 = vector.load %arg7[%c0_15, %c0_16] : memref<1x128xf32, #tpu.memory_space<vmem>>, vector<1x128xf32>
    %21 = vector.broadcast %20 : vector<1x128xf32> to vector<64x128xf32>
    %22 = arith.addf %19, %21 : vector<64x128xf32>
    %c0_17 = arith.constant 0 : index
    %c0_18 = arith.constant 0 : index
    %23 = vector.load %arg8[%c0_17, %c0_18] : memref<64x128xf32, #tpu.memory_space<vmem>>, vector<64x128xf32>
    tpu.vector_store %arg8[%c0_17, %c0_18], %22 {strides = array<i32>} : memref<64x128xf32, #tpu.memory_space<vmem>>, vector<64x128xf32>,
    return
  }
  func.func @transform_0(%arg0: i32) -> (i32, i32) {
    %c0_i32 = arith.constant 0 : i32
    %c0_i32_0 = arith.constant 0 : i32
    return %arg0, %c0_i32 : i32, i32
  }
  func.func @transform_1(%arg0: i32) -> (i32, i32) {
    %c0_i32 = arith.constant 0 : i32
    %c0_i32_0 = arith.constant 0 : i32
    %c0_i32_1 = arith.constant 0 : i32
    return %c0_i32, %c0_i32_0 : i32, i32
  }
  func.func @transform_2(%arg0: i32) -> (i32, i32) {
    %c0_i32 = arith.constant 0 : i32
    %c0_i32_0 = arith.constant 0 : i32
    %c0_i32_1 = arith.constant 0 : i32
    return %c0_i32, %c0_i32_0 : i32, i32
  }
  func.func @transform_3(%arg0: i32) -> (i32, i32) {
    %c0_i32 = arith.constant 0 : i32
    %c0_i32_0 = arith.constant 0 : i32
    %c0_i32_1 = arith.constant 0 : i32
    return %c0_i32, %c0_i32_0 : i32, i32
  }
  func.func @transform_4(%arg0: i32) -> (i32, i32) {
    %c0_i32 = arith.constant 0 : i32
    %c0_i32_0 = arith.constant 0 : i32
    %c0_i32_1 = arith.constant 0 : i32
    return %c0_i32, %c0_i32_0 : i32, i32
  }
  func.func @transform_5(%arg0: i32) -> (i32, i32) {
    %c0_i32 = arith.constant 0 : i32
    %c0_i32_0 = arith.constant 0 : i32
    %c0_i32_1 = arith.constant 0 : i32
    return %c0_i32, %c0_i32_0 : i32, i32
  }
  func.func @transform_6(%arg0: i32) -> (i32, i32) {
    %c0_i32 = arith.constant 0 : i32
    %c0_i32_0 = arith.constant 0 : i32
    %c0_i32_1 = arith.constant 0 : i32
    return %c0_i32, %c0_i32_0 : i32, i32
  }
  func.func @transform_7(%arg0: i32) -> (i32, i32) {
    %c0_i32 = arith.constant 0 : i32
    %c0_i32_0 = arith.constant 0 : i32
    return %arg0, %c0_i32 : i32, i32
  }
}

</mosaic_0001>

<bundles_post_ra>
// kernel: tpu_custom_call.1
= control target key start
LH: loop header
LB: loop body
LE: loop exit
PB: predicated region body
PF: predicated region fallthrough
CT: control target
= control target key end

     0   :  { %12 = vsyncpa [#allocation3], 0  ;;  %s1127_s0 = inlined_call_operand.vmem [shape: f32[256,8], index: 0, kind: input, shape index: {}]   ;;  %s1128_s1 = inlined_call_operand.vmem [shape: bf16[8,64], index: 1, kind: input, shape index: {}]   ;;  %s1129_s2 = inlined_call_operand.vmem [shape: f32[1,64], index: 2, kind: input, shape index: {}]   ;;  %s1130_s3 = inlined_call_operand.vmem [shape: bf16[64,64], index: 3, kind: input, shape index: {}]   ;;  %s1131_s4 = inlined_call_operand.vmem [shape: f32[1,64], index: 4, kind: input, shape index: {}]   ;;  %s1132_s5 = inlined_call_operand.vmem [shape: bf16[64,128], index: 5, kind: input, shape index: {}]   ;;  %s1133_s6 = inlined_call_operand.vmem [shape: f32[1,128], index: 6, kind: input, shape index: {}]   ;;  %s1134_s7 = inlined_call_operand.hbm [shape: f32[256,128], index: 7, kind: output, shape index: {}]  }
   0x1   :  { %14 = vsyncpa [#allocation3 + $0x1], 0  ;;  %s978_s24 = smov 0   ;;  %s980_s25 = smov 0  }
   0x2   :  { %s982_s26 = smov 0   ;;  %s984_s27 = smov 0  }
   0x3 LB: > { %s999_s28 = sadd.s32 4294967295, %s933_s27   ;;  %s724_s29 = sadd.s32 4294967294, %s933_s27   ;;  %s933_s27 = sphi %s984_s27, %s1140_s27   ;;  %s929_s26 = sphi %s982_s26, %s1139_s26   ;;  %s925_s25 = sphi %s980_s25, %s1138_s25   ;;  %s921_s24 = sphi %s978_s24, %s1137_s24  }
   0x4   : > { %s1003_s30 = sadd.s32 1, %s933_s27   ;;  %s179_s8 = sadd.s32 1, %s929_s26 }
   0x5   : > { %s176_s9 = ssub.s32 %s933_s27, %s1003_s30  ;;  %p189_p0 = scmp.ne.s32.totalorder %s929_s26, %s925_s25 }
   0x6   : > { %p177_p1 = scmp.eq.s32.totalorder %s176_s9, 0  ;;  %p190_p2 = scmp.eq.s32.totalorder %s999_s28, 3 }
   0x7   : > { %p195_p3 = scmp.ne.s32.totalorder %s925_s25, %s921_s24  ;;  %p196_p4 = scmp.eq.s32.totalorder %s724_s29, 3 }
   0x8   : > { %s1014_s10 = scalar_select %p177_p1, %s929_s26, %s179_s8  }
   0x9   : > { %p1016_p5 = por %p190_p2, %p189_p0  ;;  %p1020_p6 = por %p196_p4, %p195_p3 }
   0xa   : > { %p727_p7 = scmp.ge.s32.totalorder %s933_s27, 1  ;;  %p241_p8 = scmp.lt.s32.totalorder %s933_s27, 5 }
   0xc   : > { %p242_p9 = pnand %p727_p7, %p241_p8 }
   0xd   : > { %s729_s15 = sshll.u32 (!%p242_p9), %s999_s28, 3  ;;  %s270_s9 = sand.u32 (!%p242_p9), 1, %s925_s25  }
   0xe   : > { %245 = sbr.rel (%p242_p9) target bundleno = 661 (0x295), region = 48  ;;  %p274_p10 = scmp.lt.s32.totalorder (!%p242_p9), %s729_s15, 31 }
   0xf   : > { %s728_s13 = sshll.u32 (!%p242_p9), %s270_s9, 6  ;;  %s759_s17 = sshll.u32 (!%p242_p9), %s999_s28, 10 }
  0x10   : > { %s272_s16 = scalar_lea.vmem (!%p242_p9), [#allocation2], %s728_s13  ;;  %s1087_s28 = scalar_lea.sflag (!%p242_p9), [#allocation3], %s270_s9 }
  0x11   : > { %s935_s23 = smov (!%p242_p9), [#allocation2]  }
  0x12   : > { %s877_s29 = sshll.u32 (!%p242_p9), %s935_s23, 4  ;;  %s878_s29 = int_to_ptr.vmem [resolvable:$false] %s877_s29 }
  0x13   : > { %v293_v0 = vld [vmem:[%s1128_s1] sm:$0xf]  ;;  %vm314_vm0 = vcmask 1043456   ;;  %v865_v1 = vld [vmem:[%s1130_s3 + $0x18] sm:$0xff]   ;;  %s1142_s15 = smov (!%p274_p10, %s729_s15), 31  ;;  %vm301_vm1 = vcmask 64512  }
  0x14   : > { %823 = vmatprep.subr.msk.bf16.mxu0 %vm314_vm0, %v293_v0  ;;  %v316_v2 = vsel %vm314_vm0, %v293_v0, 0  ;;  %791 = vmatprep.subr.bf16.mxu1 %v865_v1  ;;  %s730_s18 = sshll.u32 %s1142_s15, 3  ;;  %v866_v15 = vld [vmem:[%s1130_s3 + $0x10] sm:$0xff]   ;;  %v867_v16 = vld [vmem:[%s1130_s3 + $0x8] sm:$0xff]   ;;  %v868_v17 = vld [vmem:[%s1130_s3] sm:$0xff]   ;;  %vm434_vm2 = vcmask 523264  }
  0x15   : > { %782 = vmatpush3.bf16.msra.mxu0 %v316_v2  ;;  %792 = vmatpush3.bf16.msra.mxu1 %v865_v1  ;;  %s277_s21 = scalar_lea.vmem %s1127_s0, %s730_s18  ;;  %v869_v18 = vld [vmem:[%s1132_s5 + $0x18] sm:$0xff]   ;;  %v731_v21 = vld [vmem:[%s1129_s2] ss:$0 sm:$0xff]  ;;  %v870_v48 = vld [vmem:[%s1132_s5 + $0x10] sm:$0xff]   ;;  %s662_s18 = sshll.u32 %s272_s16, 4  ;;  %s1083_s18 = int_to_ptr.vmem [resolvable:$true] %s662_s18 }
  0x16   : > { %v281_v3 = vld [vmem:[%s277_s21] sm:$0xff]  ;;  %v282_v4 = vld [vmem:[%s277_s21 + $0x8] sm:$0xff]  ;;  %v283_v5 = vld [vmem:[%s277_s21 + $0x10] sm:$0xff]  ;;  %793 = vmatprep.subr.bf16.mxu1 %v866_v15  ;;  %807 = vmatprep.subr.bf16.mxu0 %v869_v18  ;;  %s873_s22 = scalar_lea.vmem %s1083_s18, 1024  ;;  %s879_s8 = scalar_lea.vmem %s878_s29, 2048 }
  0x17   : > { %v289_v6 = vpack.c.bf16 %v282_v4, %v281_v3  ;;  %v284_v7 = vld [vmem:[%s277_s21 + $0x18] sm:$0xff]  ;;  %v285_v8 = vld [vmem:[%s277_s21 + $0x20] sm:$0xff]  ;;  %v286_v9 = vld [vmem:[%s277_s21 + $0x28] sm:$0xff]  ;;  %p874_p11 = scmp.ne.s32.totalorder %s1083_s18, %s873_s22  ;;  %p880_p0 = scmp.lt.s32.totalorder %s1083_s18, %s878_s29 }
  0x18   : > { %v290_v10 = vpack.c.bf16 %v284_v7, %v283_v5  ;;  %v291_v11 = vpack.c.bf16 %v286_v9, %v285_v8  ;;  %v287_v12 = vld [vmem:[%s277_s21 + $0x30] sm:$0xff]  ;;  %v288_v13 = vld [vmem:[%s277_s21 + $0x38] sm:$0xff]  ;;  %v871_v49 = vld [vmem:[%s1132_s5 + $0x8] sm:$0xff]   ;;  %s1081_s21 = scalar_lea.hbm %s1134_s7, %s759_s17  ;;  %p881_p1 = scmp.lt.s32.totalorder %s879_s8, %s873_s22 }
  0x19   : > { %783 = vmatprep.mubr.msk.bf16.mxu0 %vm301_vm1, %v289_v6  ;;  %v292_v14 = vpack.c.bf16 %v288_v13, %v287_v12  ;;  %794 = vmatpush3.bf16.msra.mxu1 %v866_v15  ;;  %v872_v50 = vld [vmem:[%s1132_s5] sm:$0xff]   ;;  %p875_p12 = pnand %p874_p11, %p1016_p5 }
  0x1a   : > { %784 = vmatmul.mubr.msk.bf16.vlgmr.msra.gmra.mxu0 %vm301_vm1, %v290_v10  ;;  %795 = vmatprep.subr.bf16.mxu1 %v867_v16  ;;  %v736_v53 = vld [vmem:[%s1131_s4] ss:$0 sm:$0xff]  ;;  %p882_p2 = por %p881_p1, %p880_p0 }
  0x1b   : > { %787 = vmatprep.mubr.msk.bf16.mxu0 %vm301_vm1, %v291_v11  ;;  %808 = vmatpush3.bf16.msra.mxu0 %v869_v18  ;;  %p876_p13 = pneg %p875_p12 }
  0x1c   : > { %809 = vmatprep.subr.bf16.mxu0 %v870_v48 }
  0x1d   : > { %796 = vmatpush3.bf16.msra.mxu1 %v867_v16  ;;  %v745_v16 = vld [vmem:[%s1133_s6] ss:$0 sm:$0xff]  ;;  %p883_p3 = pnand %p882_p2, %p876_p13 }
  0x1e   : > { %797 = vmatprep.subr.bf16.mxu1 %v868_v17 }
  0x1f   : > { %810 = vmatpush3.bf16.msra.mxu0 %v870_v48 }
  0x20   : > { %811 = vmatprep.subr.bf16.mxu0 %v871_v49 }
  0x21   : > { %798 = vmatpush3.bf16.msra.mxu1 %v868_v17 }
  0x22   : > { %788 = vmatmul.mubr.msk.bf16.gmra.mxu0 %vm301_vm1, %v292_v14 }
  0x23   : > { %812 = vmatpush3.bf16.msra.mxu0 %v871_v49 }
  0x24   : > { %813 = vmatprep.subr.bf16.mxu0 %v872_v50 }
  0x27   : > { %814 = vmatpush3.bf16.msra.mxu0 %v872_v50 }
  0xda   : > { %v785_v19 = vpop.f32.mrf.mxu0 }
  0xdb   : > { %v361_v25 = vadd.f32 %v785_v19, %v731_v21 }
  0xdc   : > { %v352_v20 = vpop.f32.mrf.mxu0 }
  0xdd   : > { %v353_v23 = vadd.f32 %v731_v21, %v352_v20  ;;  %v385_v32 = vmax.f32 %v361_v25, 0.0 }
  0xde   : > { %v786_v22 = vpop.f32.mrf.mxu0 }
  0xdf   : > { %v364_v24 = vadd.f32 %v786_v22, %v731_v21  ;;  %v383_v30 = vmax.f32 %v353_v23, 0.0 }
  0xe0   : > { %v355_v26 = vpop.f32.mrf.mxu0 }
  0xe1   : > { %v356_v27 = vadd.f32 %v731_v21, %v355_v26  ;;  %v386_v28 = vmax.f32 %v364_v24, 0.0 }
  0xe2   : > { %v789_v29 = vpop.f32.mrf.mxu0 }
  0xe3   : > { %v384_v31 = vmax.f32 %v356_v27, 0.0  ;;  %v392_v35 = vpack.c.bf16 %v386_v28, %v385_v32  ;;  %v377_v39 = vadd.f32 %v789_v29, %v731_v21 }
  0xe4   : > { %v368_v33 = vpop.f32.mrf.mxu0 }
  0xe5   : > { %v391_v34 = vpack.c.bf16 %v384_v31, %v383_v30  ;;  %v369_v37 = vadd.f32 %v731_v21, %v368_v33  ;;  %v389_v45 = vmax.f32 %v377_v39, 0.0 }
  0xe6   : > { %v790_v36 = vpop.f32.mrf.mxu0 }
  0xe7   : > { %v380_v38 = vadd.f32 %v790_v36, %v731_v21  ;;  %799 = vmatprep.mubr.msk.bf16.mxu1 %vm434_vm2, %v391_v34  ;;  %v387_v43 = vmax.f32 %v369_v37, 0.0 }
  0xe8   : > { %v371_v40 = vpop.f32.mrf.mxu0  ;;  %800 = vmatmul.mubr.msk.bf16.vlgmr.msra.gmra.mxu1 %vm434_vm2, %v392_v35 }
  0xe9   : > { %v372_v41 = vadd.f32 %v731_v21, %v371_v40  ;;  %v390_v42 = vmax.f32 %v380_v38, 0.0 }
  0xeb   : > { %v388_v44 = vmax.f32 %v372_v41, 0.0  ;;  %v394_v47 = vpack.c.bf16 %v390_v42, %v389_v45 }
  0xed   : > { %v393_v46 = vpack.c.bf16 %v388_v44, %v387_v43 }
  0xef   : > { %803 = vmatprep.mubr.msk.bf16.mxu1 %vm434_vm2, %v393_v46 }
  0xf0   : > { %804 = vmatmul.mubr.msk.bf16.gmra.mxu1 %vm434_vm2, %v394_v47 }
 0x1a8   : > { %v801_v51 = vpop.f32.mrf.mxu1 }
 0x1a9   : > { %v490_v57 = vadd.f32 %v801_v51, %v736_v53 }
 0x1aa   : > { %v481_v52 = vpop.f32.mrf.mxu1 }
 0x1ab   : > { %v482_v55 = vadd.f32 %v736_v53, %v481_v52  ;;  %v514_v0 = vmax.f32 %v490_v57, 0.0 }
 0x1ac   : > { %v802_v54 = vpop.f32.mrf.mxu1 }
 0x1ad   : > { %v493_v56 = vadd.f32 %v802_v54, %v736_v53  ;;  %v512_v62 = vmax.f32 %v482_v55, 0.0 }
 0x1ae   : > { %v484_v58 = vpop.f32.mrf.mxu1 }
 0x1af   : > { %v485_v59 = vadd.f32 %v736_v53, %v484_v58  ;;  %v515_v60 = vmax.f32 %v493_v56, 0.0 }
 0x1b0   : > { %v805_v61 = vpop.f32.mrf.mxu1 }
 0x1b1   : > { %v513_v63 = vmax.f32 %v485_v59, 0.0  ;;  %v521_v3 = vpack.c.bf16 %v515_v60, %v514_v0  ;;  %v506_v7 = vadd.f32 %v805_v61, %v736_v53 }
 0x1b2   : > { %v497_v1 = vpop.f32.mrf.mxu1 }
 0x1b3   : > { %v520_v2 = vpack.c.bf16 %v513_v63, %v512_v62  ;;  %v498_v5 = vadd.f32 %v736_v53, %v497_v1  ;;  %v518_v13 = vmax.f32 %v506_v7, 0.0 }
 0x1b4   : > { %v806_v4 = vpop.f32.mrf.mxu1 }
 0x1b5   : > { %v509_v6 = vadd.f32 %v806_v4, %v736_v53  ;;  %815 = vmatprep.mubr.msk.bf16.mxu0 %vm434_vm2, %v520_v2  ;;  %v516_v11 = vmax.f32 %v498_v5, 0.0 }
 0x1b6   : > { %v500_v8 = vpop.f32.mrf.mxu1  ;;  %816 = vmatmul.mubr.msk.bf16.vlgmr.msra.gmra.mxu0 %vm434_vm2, %v521_v3 }
 0x1b7   : > { %v501_v9 = vadd.f32 %v736_v53, %v500_v8  ;;  %v519_v10 = vmax.f32 %v509_v6, 0.0 }
 0x1b9   : > { %v517_v12 = vmax.f32 %v501_v9, 0.0  ;;  %v523_v15 = vpack.c.bf16 %v519_v10, %v518_v13 }
 0x1bb   : > { %v522_v14 = vpack.c.bf16 %v517_v12, %v516_v11 }
 0x1bd   : > { %819 = vmatprep.mubr.msk.bf16.mxu0 %vm434_vm2, %v522_v14 }
 0x1be   : > { %820 = vmatmul.mubr.msk.bf16.gmra.mxu0 %vm434_vm2, %v523_v15 }
 0x276   : > { %v817_v17 = vpop.f32.mrf.mxu0 }
 0x277   : > { %v618_v18 = vadd.f32 %v817_v17, %v745_v16 }
 0x278   : > { %v609_v19 = vpop.f32.mrf.mxu0 }
 0x279   : > { %642 = vst [vmem:[%s272_s16 + $0x10] sm:$0xff] %v618_v18  ;;  %v610_v20 = vadd.f32 %v745_v16, %v609_v19 }
 0x27a   : > { %v818_v21 = vpop.f32.mrf.mxu0 }
 0x27b   : > { %640 = vst [vmem:[%s272_s16] sm:$0xff] %v610_v20  ;;  %v621_v22 = vadd.f32 %v818_v21, %v745_v16 }
 0x27c   : > { %v612_v23 = vpop.f32.mrf.mxu0 }
 0x27d   : > { %643 = vst [vmem:[%s272_s16 + $0x18] sm:$0xff] %v621_v22  ;;  %v613_v24 = vadd.f32 %v745_v16, %v612_v23 }
 0x27e   : > { %v821_v25 = vpop.f32.mrf.mxu0 }
 0x27f   : > { %641 = vst [vmem:[%s272_s16 + $0x8] sm:$0xff] %v613_v24  ;;  %v634_v26 = vadd.f32 %v821_v25, %v745_v16 }
 0x280   : > { %v625_v27 = vpop.f32.mrf.mxu0 }
 0x281   : > { %646 = vst [vmem:[%s272_s16 + $0x30] sm:$0xff] %v634_v26  ;;  %v626_v28 = vadd.f32 %v745_v16, %v625_v27 }
 0x282   : > { %v822_v29 = vpop.f32.mrf.mxu0 }
 0x283   : > { %644 = vst [vmem:[%s272_s16 + $0x20] sm:$0xff] %v626_v28  ;;  %v637_v30 = vadd.f32 %v822_v29, %v745_v16 }
 0x284   : > { %v628_v31 = vpop.f32.mrf.mxu0 }
 0x285   : > { %647 = vst [vmem:[%s272_s16 + $0x38] sm:$0xff] %v637_v30  ;;  %v629_v32 = vadd.f32 %v745_v16, %v628_v31 }
 0x287   : > { %645 = vst [vmem:[%s272_s16 + $0x28] sm:$0xff] %v629_v32 }
 0x288   : > { %886 = shalt.err (!%p883_p3)
}
 0x289   : > { %s887_s9 = scalar_lea.hbm %s1081_s21, 1024  ;;  %s891_s15 = scalar_lea.hbm %s1134_s7, 4096 }
 0x28a   : > { %p888_p4 = scmp.ne.s32.totalorder %s1081_s21, %s887_s9  ;;  %p892_p9 = scmp.lt.s32.totalorder %s1081_s21, %s1134_s7 }
 0x28b   : > { %p893_p10 = scmp.lt.s32.totalorder %s891_s15, %s887_s9 }
 0x28c   : > { %p889_p7 = pnand %p888_p4, %p1016_p5 }
 0x28d   : > { %p894_p11 = por %p893_p10, %p892_p9 }
 0x28e   : > { %p890_p8 = pneg %p889_p7 }
 0x290   : > { %p895_p12 = pnand %p894_p11, %p890_p8 }
 0x292   : > { %898 = shalt.err (!%p895_p12)
}
 0x293   : > { %s936_s19 = smov 128   ;;  %s937_s20 = smov 8  }
 0x294   : > { %824 = dma.vmem_to_hbm [thread:$0]  (%p1016_p5), %s1083_s18, 1024, %s1081_s21, %s1087_s28, %s936_s19, %s936_s19, %s937_s20  }
 0x295 PF: > { %p830_p13 = scmp.ge.s32.totalorder %s933_s27, 2  ;;  %s677_s22 = sand.u32 1, %s921_s24  }
 0x296   : > { %s678_s23 = scalar_lea.sflag [#allocation3], %s677_s22 }
 0x297   : > { %p827_p0 = pnand %p830_p13, %p1020_p6 }
 0x299   : > { %p828_p1 = pneg %p827_p0 }
 0x29b   : > { %916 = dma.done.wait (%p828_p1), %s678_s23, 1024  }
 0x29c   : > { %918 = vsyncadd (%p828_p1), %s678_s23, 4294966272  ;;  %p17_p2 = scmp.ge.s32.totalorder %s1003_s30, 6   ;;  %s1137_s24 = smov %s925_s25 }
 0x29d   : > { %s1138_s25 = smov %s929_s26  ;;  %s1139_s26 = smov %s1014_s10 }
 0x29e   : > { %s1140_s27 = smov %s1003_s30  ;;  %19 = sbr.rel (!%p17_p2) target bundleno = 3 (0x3), region = 83 }
 0x2a3   :  { %683 = vsyncpa [#allocation3], 1 }
 0x2a4   :  { %685 = vsyncpa [#allocation3 + $0x1], 1 }

</bundles_post_ra>
